<compile_context>
chip_gen: v7x
topology: tpu7x:2x2x1
jax: 0.10.0
libtpu: 0.0.40
codegen_flags: <defaults>
</compile_context>

<pallas_src>
import math

import jax
import jax.numpy as jnp
from jax.experimental import pallas as pl
from jax.experimental.pallas import tpu as pltpu


def _round_up(x: int, m: int) -> int:
    return (x + m - 1) // m * m


def _tpu_defaults():
    """Per-generation (row-tile target, VMEM budget in bytes)."""
    cap = 128 * 1024 * 1024
    try:
        info = pltpu.get_tpu_info()
        cap = int(getattr(info, "vmem_capacity_bytes", cap))
    except Exception:
        pass
    kind = ""
    try:
        kind = jax.devices()[0].device_kind.lower()
    except Exception:
        pass
    if cap <= 64 * 1024 * 1024:
        tm = 512            # v7x-class: 64 MiB VMEM / TC, high HBM BW per TC
    elif ("v5e" in kind) or ("v5 lite" in kind) or ("v5lite" in kind):
        tm = 512            # v5e: TM >= 256 already balances HBM vs MXU
    else:
        tm = 1024           # v6e-class 128 MiB parts: big TM hides weight DMA
    budget = int(min(cap * 3 // 4, 100 * 1024 * 1024))   # 48 MiB v7x, 96-100 MiB else
    return tm, budget


def _gelu_tanh(x):
    # PyTorch "gelu_pytorch_tanh" (tanh approximation), computed in f32.
    c = math.sqrt(2.0 / math.pi)
    return 0.5 * x * (1.0 + jnp.tanh(c * (x + 0.044715 * x * x * x)))


# --------------------------------------------------------------------------
# Kernels
# --------------------------------------------------------------------------
def _mlp_kernel_resident(x_ref, w1_ref, b1_ref, w2_ref, b2_ref, o_ref):
    """Weights fully VMEM-resident; one grid axis over row tiles.

    x_ref:(TM,H_p)  w1_ref:(H_p,I_p)  b1_ref:(1,I_p)f32
    w2_ref:(I_p,H_p)  b2_ref:(1,H_p)f32  o_ref:(TM,H_p)
    """
    h = jnp.dot(x_ref[...], w1_ref[...], preferred_element_type=jnp.float32)
    h = _gelu_tanh(h + b1_ref[...])                        # f32 GELU
    out = jnp.dot(h.astype(w2_ref.dtype), w2_ref[...],
                  preferred_element_type=jnp.float32)
    o_ref[...] = (out + b2_ref[...]).astype(o_ref.dtype)


def _mlp_kernel_slabbed(x_ref, w1_ref, b1_ref, w2_ref, b2_ref, o_ref, acc_ref):
    """Intermediate dim streamed in TI slabs; grid = (row tiles, I slabs).

    x_ref:(TM,H_p)  w1_ref:(H_p,TI)  b1_ref:(1,TI)f32
    w2_ref:(TI,H_p)  b2_ref:(1,H_p)f32  o_ref:(TM,H_p)  acc_ref:(TM,H_p)f32
    """
    ti = pl.program_id(1)

    h = jnp.dot(x_ref[...], w1_ref[...], preferred_element_type=jnp.float32)
    h = _gelu_tanh(h + b1_ref[...])
    partial = jnp.dot(h.astype(w2_ref.dtype), w2_ref[...],
                      preferred_element_type=jnp.float32)

    @pl.when(ti == 0)                        # store directly: no zero-fill+read
    def _():
        acc_ref[...] = partial

    @pl.when(ti > 0)
    def _():
        acc_ref[...] += partial

    @pl.when(ti == pl.num_programs(1) - 1)
    def _():
        o_ref[...] = (acc_ref[...] + b2_ref[...]).astype(o_ref.dtype)


# --------------------------------------------------------------------------
# Wrapper
# --------------------------------------------------------------------------
def prepare_siglip_mlp_params(w1, b1, w2, b2, *, compute_dtype=jnp.bfloat16,
                              ti=512, force_resident=None, vmem_budget=None):
    """One-time weight prep: cast, transpose to canonical orientation, pad.

    w1: (I, H) fc1 weight;  b1: (I,);  w2: (H, I) fc2 weight;  b2: (H,).
    """
    I, H = w1.shape
    assert w2.shape == (H, I) and b1.shape == (I,) and b2.shape == (H,)
    if vmem_budget is None:
        _, vmem_budget = _tpu_defaults()
    compute_dtype = jnp.dtype(compute_dtype)
    c_sz = compute_dtype.itemsize

    H_p = _round_up(H, 128)
    I_full = _round_up(I, 128)

    # Fully-resident weights iff both (double-buffered) fit well inside budget.
    resident_cost = 2 * (2 * I_full * H_p * c_sz)
    resident = resident_cost <= int(0.6 * vmem_budget)
    if force_resident is not None:
        resident = bool(force_resident)

    TI = I_full if resident else min(_round_up(max(int(ti), 128), 128), I_full)
    I_p = _round_up(I, TI)

    # Canonical (M,K)x(K,N): W1^T -> (H, I), W2^T -> (I, H); pad once here.
    w1t = jnp.pad(w1.astype(compute_dtype).T, ((0, H_p - H), (0, I_p - I)))
    w2t = jnp.pad(w2.astype(compute_dtype).T, ((0, I_p - I), (0, H_p - H)))
    b1_p = jnp.pad(b1.astype(jnp.float32), (0, I_p - I)).reshape(1, I_p)
    b2_p = jnp.pad(b2.astype(jnp.float32), (0, H_p - H)).reshape(1, H_p)

    return dict(w1t=w1t, w2t=w2t, b1=b1_p, b2=b2_p,
                H=H, I=I, H_p=H_p, I_p=I_p, TI=TI,
                compute_dtype=compute_dtype)


def siglip_mlp_forward(hidden_states, params, *, tm=None, vmem_limit_bytes=None):
    """SiglipMLP forward on prepared params. hidden_states: (..., H)."""
    w1t, w2t = params["w1t"], params["w2t"]
    b1_p, b2_p = params["b1"], params["b2"]
    H, H_p = params["H"], params["H_p"]
    I_p, TI = params["I_p"], params["TI"]
    compute_dtype = params["compute_dtype"]
    c_sz = compute_dtype.itemsize

    tm_default, budget_default = _tpu_defaults()
    tm = tm_default if tm is None else tm
    vmem_budget = int(vmem_limit_bytes or budget_default)

    lead = hidden_states.shape[:-1]
    assert hidden_states.shape[-1] == H
    out_dtype = hidden_states.dtype
    o_sz = jnp.dtype(out_dtype).itemsize
    M = math.prod(lead)

    resident = (TI == I_p)
    n_ti = I_p // TI

    # VMEM footprint model (pipeline keeps 2 buffers per streamed operand).
    w_bytes = 2 * (H_p * TI + TI * H_p) * c_sz

    def fits(TM):
        total = (w_bytes
                 + 2 * TM * H_p * c_sz              # x tile (double-buffered)
                 + 2 * TM * H_p * o_sz              # output tile
                 + TM * TI * (4 + c_sz)             # live GELU intermediate
                 + (0 if resident else TM * H_p * 4)  # f32 accumulator scratch
                 + 2 * (I_p + H_p) * 4)             # biases
        return total <= vmem_budget

    TM = min(_round_up(tm, 8), _round_up(M, 8))
    while TM > 128 and not fits(TM):
        TM = _round_up(TM // 2, 8)
    M_p = _round_up(M, TM)
    n_m = M_p // TM

    x2d = hidden_states.reshape(M, H).astype(compute_dtype)
    if (M_p, H_p) != (M, H):
        x2d = jnp.pad(x2d, ((0, M_p - M), (0, H_p - H)))

    # Honest bytes: streamed weights are re-fetched once per row tile.
    weight_stream_factor = 1 if resident else n_m
    cost = pl.CostEstimate(
        flops=4 * M_p * H_p * I_p,
        transcendentals=M_p * I_p,
        bytes_accessed=(x2d.size * c_sz + M_p * H_p * o_sz
                        + weight_stream_factor * (w1t.size + w2t.size) * c_sz
                        + (b1_p.size + b2_p.size) * 4),
    )

    if resident:
        grid = (n_m,)
        in_specs = [
            pl.BlockSpec((TM, H_p), lambda mi: (mi, 0)),    # x row tile
            pl.BlockSpec((H_p, I_p), lambda mi: (0, 0)),    # W1^T (resident)
            pl.BlockSpec((1, I_p), lambda mi: (0, 0)),      # b1 (resident)
            pl.BlockSpec((I_p, H_p), lambda mi: (0, 0)),    # W2^T (resident)
            pl.BlockSpec((1, H_p), lambda mi: (0, 0)),      # b2 (resident)
        ]
        out_specs = pl.BlockSpec((TM, H_p), lambda mi: (mi, 0))
        scratch_shapes = []
        kernel = _mlp_kernel_resident
        dims = ("parallel",)
    else:
        grid = (n_m, n_ti)
        in_specs = [
            pl.BlockSpec((TM, H_p), lambda mi, ki: (mi, 0)),  # x row tile
            pl.BlockSpec((H_p, TI), lambda mi, ki: (0, ki)),  # W1^T slab
            pl.BlockSpec((1, TI), lambda mi, ki: (0, ki)),    # b1 slab
            pl.BlockSpec((TI, H_p), lambda mi, ki: (ki, 0)),  # W2^T slab
            pl.BlockSpec((1, H_p), lambda mi, ki: (0, 0)),    # b2
        ]
        out_specs = pl.BlockSpec((TM, H_p), lambda mi, ki: (mi, 0))
        scratch_shapes = [pltpu.VMEM((TM, H_p), jnp.float32)]
        kernel = _mlp_kernel_slabbed
        dims = ("parallel", "arbitrary")

    out_p = pl.pallas_call(
        kernel,
        out_shape=jax.ShapeDtypeStruct((M_p, H_p), out_dtype),
        grid_spec=pltpu.PrefetchScalarGridSpec(
            num_scalar_prefetch=0,
            grid=grid,
            in_specs=in_specs,
            out_specs=out_specs,
            scratch_shapes=scratch_shapes,
        ),
        compiler_params=pltpu.CompilerParams(
            dimension_semantics=dims,
            vmem_limit_bytes=vmem_budget,
        ),
        cost_estimate=cost,
    )(x2d, w1t, b1_p, w2t, b2_p)

    return out_p[:M, :H].reshape(*lead, H)


def siglip_mlp(hidden_states, w1, b1, w2, b2, *, compute_dtype=jnp.bfloat16):
    """Convenience one-shot API (prefer preparing params once and reusing)."""
    params = prepare_siglip_mlp_params(w1, b1, w2, b2, compute_dtype=compute_dtype)
    return siglip_mlp_forward(hidden_states, params)


# --------------------------------------------------------------------------
# Test
# --------------------------------------------------------------------------
if __name__ == "__main__":
    key = jax.random.PRNGKey(0)

    def init(k, shape, scale=0.02):
        return jax.random.normal(k, shape, dtype=jnp.float32) * scale

    def ref_mlp(x, w1, b1, w2, b2):
        h = jnp.dot(x, w1.T) + b1
        h = jax.nn.gelu(h, approximate=True)        # gelu_pytorch_tanh
        return jnp.dot(h, w2.T) + b2

    # ---- Test 1: module-consistent small shapes, default path ----
    # (bf16 MXU compute, f32 accumulation, weights fully VMEM-resident)
    B, S, H, I = 2, 8, 32, 64
    kx, kw1, kb1, kw2, kb2, k2 = jax.random.split(key, 6)
    x = jax.random.normal(kx, (B, S, H), dtype=jnp.float32)
    w1, b1 = init(kw1, (I, H)), init(kb1, (I,))
    w2, b2 = init(kw2, (H, I)), init(kb2, (H,))

    params = prepare_siglip_mlp_params(w1, b1, w2, b2)           # bf16, resident
    out = jax.block_until_ready(siglip_mlp_forward(x, params))

    ref = ref_mlp(x, w1, b1, w2, b2)
    assert out.shape == (B, S, H) and out.dtype == x.dtype
    err1 = float(jnp.max(jnp.abs(out - ref)))
    assert err1 < 5e-3, f"resident-path max abs err {err1}"

    # ---- Test 2: exercise the slab-streamed reduction path (f32 compute) ----
    H2, I2 = 128, 256
    kx2, kw12, kb12, kw22, kb22 = jax.random.split(k2, 5)
    x2 = jax.random.normal(kx2, (B, S, H2), dtype=jnp.float32)
    w1b, b1b = init(kw12, (I2, H2)), init(kb12, (I2,))
    w2b, b2b = init(kw22, (H2, I2)), init(kb22, (H2,))

    params2 = prepare_siglip_mlp_params(
        w1b, b1b, w2b, b2b, compute_dtype=jnp.float32, ti=128,
        force_resident=False)                                    # 2 reduction steps
    out2 = jax.block_until_ready(siglip_mlp_forward(x2, params2))

    ref2 = ref_mlp(x2, w1b, b1b, w2b, b2b)
    err2 = float(jnp.max(jnp.abs(out2 - ref2)))
    assert err2 < 5e-3, f"slabbed-path max abs err {err2}"

    print("KERNEL_OK")
</pallas_src>

<mosaic_0001>
module attributes {stable_mosaic.version = 11 : i64} {
  func.func @_mlp_kernel_resident(%arg0: i32, %arg1: memref<16x128xbf16, #tpu.memory_space<vmem>>, %arg2: memref<128x128xbf16, #tpu.memory_space<vmem>>, %arg3: memref<1x128xf32, #tpu.memory_space<vmem>>, %arg4: memref<128x128xbf16, #tpu.memory_space<vmem>>, %arg5: memref<1x128xf32, #tpu.memory_space<vmem>>, %arg6: memref<16x128xf32, #tpu.memory_space<vmem>>) attributes {dimension_semantics = [#tpu.dimension_semantics<parallel>], iteration_bounds = array<i64: 1>, scalar_prefetch = 0 : i64, scratch_operands = 0 : i64, tpu.core_type = #tpu.core_type<tc>, window_params = [{transform_indices = @transform_0, window_bounds = array<i64: 16, 128>}, {pipeline_mode = #tpu.pipeline_mode<synchronous>, transform_indices = @transform_1, window_bounds = array<i64: 128, 128>}, {pipeline_mode = #tpu.pipeline_mode<synchronous>, transform_indices = @transform_2, window_bounds = array<i64: 1, 128>}, {pipeline_mode = #tpu.pipeline_mode<synchronous>, transform_indices = @transform_3, window_bounds = array<i64: 128, 128>}, {pipeline_mode = #tpu.pipeline_mode<synchronous>, transform_indices = @transform_4, window_bounds = array<i64: 1, 128>}, {transform_indices = @transform_5, window_bounds = array<i64: 16, 128>}]} {
    %c0 = arith.constant 0 : index
    %c0_0 = arith.constant 0 : index
    %0 = vector.load %arg1[%c0, %c0_0] : memref<16x128xbf16, #tpu.memory_space<vmem>>, vector<16x128xbf16>
    %c0_1 = arith.constant 0 : index
    %c0_2 = arith.constant 0 : index
    %1 = vector.load %arg2[%c0_1, %c0_2] : memref<128x128xbf16, #tpu.memory_space<vmem>>, vector<128x128xbf16>
    %cst = arith.constant dense<0.000000e+00> : vector<16x128xf32>
    %2 = tpu.matmul %0, %1, %cst {dimension_numbers = #tpu.dot_dimension_numbers<[1], [0], [0], [1], [0, 0, 1, 1], [], []>} : vector<16x128xbf16>, vector<128x128xbf16>, vector<16x128xf32> -> vector<16x128xf32>
    %c0_3 = arith.constant 0 : index
    %c0_4 = arith.constant 0 : index
    %3 = vector.load %arg3[%c0_3, %c0_4] : memref<1x128xf32, #tpu.memory_space<vmem>>, vector<1x128xf32>
    %4 = vector.broadcast %3 : vector<1x128xf32> to vector<16x128xf32>
    %5 = arith.addf %2, %4 : vector<16x128xf32>
    %cst_5 = arith.constant 5.000000e-01 : f32
    %6 = vector.broadcast %cst_5 : f32 to vector<16x128xf32>
    %7 = arith.mulf %6, %5 : vector<16x128xf32>
    %cst_6 = arith.constant 4.471500e-02 : f32
    %8 = vector.broadcast %cst_6 : f32 to vector<16x128xf32>
    %9 = arith.mulf %8, %5 : vector<16x128xf32>
    %10 = arith.mulf %9, %5 : vector<16x128xf32>
    %11 = arith.mulf %10, %5 : vector<16x128xf32>
    %12 = arith.addf %5, %11 : vector<16x128xf32>
    %cst_7 = arith.constant 0.797884583 : f32
    %13 = vector.broadcast %cst_7 : f32 to vector<16x128xf32>
    %14 = arith.mulf %13, %12 : vector<16x128xf32>
    %15 = math.tanh %14 : vector<16x128xf32>
    %cst_8 = arith.constant 1.000000e+00 : f32
    %16 = vector.broadcast %cst_8 : f32 to vector<16x128xf32>
    %17 = arith.addf %16, %15 : vector<16x128xf32>
    %18 = arith.mulf %7, %17 : vector<16x128xf32>
    %19 = arith.truncf %18 : vector<16x128xf32> to vector<16x128xbf16>
    %c0_9 = arith.constant 0 : index
    %c0_10 = arith.constant 0 : index
    %20 = vector.load %arg4[%c0_9, %c0_10] : memref<128x128xbf16, #tpu.memory_space<vmem>>, vector<128x128xbf16>
    %cst_11 = arith.constant dense<0.000000e+00> : vector<16x128xf32>
    %21 = tpu.matmul %19, %20, %cst_11 {dimension_numbers = #tpu.dot_dimension_numbers<[1], [0], [0], [1], [0, 0, 1, 1], [], []>} : vector<16x128xbf16>, vector<128x128xbf16>, vector<16x128xf32> -> vector<16x128xf32>
    %c0_12 = arith.constant 0 : index
    %c0_13 = arith.constant 0 : index
    %22 = vector.load %arg5[%c0_12, %c0_13] : memref<1x128xf32, #tpu.memory_space<vmem>>, vector<1x128xf32>
    %23 = vector.broadcast %22 : vector<1x128xf32> to vector<16x128xf32>
    %24 = arith.addf %21, %23 : vector<16x128xf32>
    %c0_14 = arith.constant 0 : index
    %c0_15 = arith.constant 0 : index
    %25 = vector.load %arg6[%c0_14, %c0_15] : memref<16x128xf32, #tpu.memory_space<vmem>>, vector<16x128xf32>
    tpu.vector_store %arg6[%c0_14, %c0_15], %24 {strides = array<i32>} : memref<16x128xf32, #tpu.memory_space<vmem>>, vector<16x128xf32>,
    return
  }
  func.func @transform_0(%arg0: i32) -> (i32, i32) {
    %c0_i32 = arith.constant 0 : i32
    %c0_i32_0 = arith.constant 0 : i32
    return %arg0, %c0_i32 : i32, i32
  }
  func.func @transform_1(%arg0: i32) -> (i32, i32) {
    %c0_i32 = arith.constant 0 : i32
    %c0_i32_0 = arith.constant 0 : i32
    %c0_i32_1 = arith.constant 0 : i32
    return %c0_i32, %c0_i32_0 : i32, i32
  }
  func.func @transform_2(%arg0: i32) -> (i32, i32) {
    %c0_i32 = arith.constant 0 : i32
    %c0_i32_0 = arith.constant 0 : i32
    %c0_i32_1 = arith.constant 0 : i32
    return %c0_i32, %c0_i32_0 : i32, i32
  }
  func.func @transform_3(%arg0: i32) -> (i32, i32) {
    %c0_i32 = arith.constant 0 : i32
    %c0_i32_0 = arith.constant 0 : i32
    %c0_i32_1 = arith.constant 0 : i32
    return %c0_i32, %c0_i32_0 : i32, i32
  }
  func.func @transform_4(%arg0: i32) -> (i32, i32) {
    %c0_i32 = arith.constant 0 : i32
    %c0_i32_0 = arith.constant 0 : i32
    %c0_i32_1 = arith.constant 0 : i32
    return %c0_i32, %c0_i32_0 : i32, i32
  }
  func.func @transform_5(%arg0: i32) -> (i32, i32) {
    %c0_i32 = arith.constant 0 : i32
    %c0_i32_0 = arith.constant 0 : i32
    return %arg0, %c0_i32 : i32, i32
  }
}

</mosaic_0001>

<bundles_post_ra>
// kernel: tpu_custom_call.1
= control target key start
LH: loop header
LB: loop body
LE: loop exit
PB: predicated region body
PF: predicated region fallthrough
CT: control target
= control target key end

     0   :  { %10 = vsyncpa [#allocation3], 0  ;;  %s738_s0 = inlined_call_operand.hbm [shape: bf16[16,128], index: 0, kind: input, shape index: {}]   ;;  %s739_s1 = inlined_call_operand.hbm [shape: bf16[128,128], index: 1, kind: input, shape index: {}]   ;;  %s740_s2 = inlined_call_operand.hbm [shape: f32[1,128], index: 2, kind: input, shape index: {}]   ;;  %s741_s3 = inlined_call_operand.hbm [shape: bf16[128,128], index: 3, kind: input, shape index: {}]   ;;  %s742_s4 = inlined_call_operand.hbm [shape: f32[1,128], index: 4, kind: input, shape index: {}]   ;;  %s743_s5 = inlined_call_operand.hbm [shape: f32[16,128], index: 5, kind: output, shape index: {}]  }
   0x1   :  { %11 = vsyncpa [#allocation6], 0 }
   0x2   :  { %12 = vsyncpa [#allocation9], 0 }
   0x3   :  { %13 = vsyncpa [#allocation4], 0  ;;  %s608_s18 = smov [#allocation5]   ;;  %s609_s20 = smov [#allocation8]  }
   0x4   :  { %s31_s19 = sshll.u32 %s608_s18, 4  ;;  %s53_s21 = sshll.u32 %s609_s20, 4  ;;  %s32_s19 = int_to_ptr.vmem [resolvable:$true] %s31_s19  ;;  %s650_s21 = int_to_ptr.vmem [resolvable:$true] %s53_s21 }
   0x5   :  { %s468_s24 = scalar_lea.hbm %s739_s1, 1024 }
   0x6   :  { %p469_p0 = scmp.ne.s32.totalorder %s739_s1, %s468_s24  ;;  %p472_p1 = scmp.lt.u32.totalorder %s468_s24, %s739_s1 }
   0x8   :  { %p474_p2 = pnand %p472_p1, %p469_p0 }
   0xa   :  { %477 = shalt.err (!%p474_p2)
}
   0xb   :  { %s478_s29 = scalar_lea.vmem %s32_s19, 1024  ;;  %p483_p4 = scmp.lt.s32.totalorder %s32_s19, %s32_s19 }
   0xc   :  { %p479_p3 = scmp.ne.s32.totalorder %s32_s19, %s478_s29  ;;  %p484_p5 = scmp.lt.s32.totalorder %s478_s29, %s478_s29 }
   0xe   :  { %p485_p6 = por %p484_p5, %p483_p4 }
  0x10   :  { %p486_p7 = pnand %p485_p6, %p479_p3 }
  0x12   :  { %489 = shalt.err (!%p486_p7)
}
  0x13   :  { %s610_s30 = smov 64   ;;  %s611_s6 = smov 4  }
  0x14   :  { %37 = dma.hbm_to_vmem [thread:$0]  %s739_s1, 1024, %s32_s19, [#allocation6], %s610_s30, %s610_s30, %s611_s6  }
  0x15   :  { %s490_s11 = scalar_lea.hbm %s741_s3, 1024 }
  0x16   :  { %p491_p8 = scmp.ne.s32.totalorder %s741_s3, %s490_s11  ;;  %p494_p9 = scmp.lt.u32.totalorder %s490_s11, %s741_s3 }
  0x18   :  { %p496_p10 = pnand %p494_p9, %p491_p8 }
  0x1a   :  { %499 = shalt.err (!%p496_p10)
}
  0x1b   :  { %s500_s16 = scalar_lea.vmem %s650_s21, 1024  ;;  %p505_p12 = scmp.lt.s32.totalorder %s650_s21, %s650_s21 }
  0x1c   :  { %p501_p11 = scmp.ne.s32.totalorder %s650_s21, %s500_s16  ;;  %p506_p13 = scmp.lt.s32.totalorder %s500_s16, %s500_s16 }
  0x1e   :  { %p507_p0 = por %p506_p13, %p505_p12 }
  0x20   :  { %p508_p1 = pnand %p507_p0, %p501_p11 }
  0x22   :  { %511 = shalt.err (!%p508_p1)
}
  0x23   :  { %59 = dma.hbm_to_vmem [thread:$0]  %s741_s3, 1024, %s650_s21, [#allocation9], %s610_s30, %s610_s30, %s611_s6  }
  0x24   :  { %s612_s18 = smov [#allocation2]   ;;  %s613_s20 = smov [#allocation7]  }
  0x25   :  { %s19_s19 = sshll.u32 %s612_s18, 4  ;;  %s44_s22 = sshll.u32 %s613_s20, 4  ;;  %s20_s19 = int_to_ptr.vmem [resolvable:$true] %s19_s19  ;;  %s45_s22 = int_to_ptr.vmem [resolvable:$true] %s44_s22 }
  0x26   :  { %s512_s25 = scalar_lea.hbm %s738_s0, 128 }
  0x27   :  { %p513_p2 = scmp.ne.s32.totalorder %s738_s0, %s512_s25  ;;  %p516_p3 = scmp.lt.u32.totalorder %s512_s25, %s738_s0 }
  0x29   :  { %p518_p4 = pnand %p516_p3, %p513_p2 }
  0x2b   :  { %521 = shalt.err (!%p518_p4)
}
  0x2c   :  { %s522_s3 = scalar_lea.vmem %s20_s19, 128  ;;  %p527_p6 = scmp.lt.s32.totalorder %s20_s19, %s20_s19 }
  0x2d   :  { %p523_p5 = scmp.ne.s32.totalorder %s20_s19, %s522_s3  ;;  %p528_p7 = scmp.lt.s32.totalorder %s522_s3, %s522_s3 }
  0x2f   :  { %p529_p8 = por %p528_p7, %p527_p6 }
  0x31   :  { %p530_p9 = pnand %p529_p8, %p523_p5 }
  0x33   :  { %533 = shalt.err (!%p530_p9)
}
  0x34   :  { %25 = dma.hbm_to_vmem [thread:$0]  %s738_s0, 128, %s20_s19, [#allocation3], %s610_s30, %s610_s30, %s611_s6  }
  0x35   :  { %s534_s10 = scalar_lea.hbm %s740_s2, 16 }
  0x36   :  { %p535_p10 = scmp.ne.s32.totalorder %s740_s2, %s534_s10  ;;  %p538_p11 = scmp.lt.u32.totalorder %s534_s10, %s740_s2 }
  0x38   :  { %p540_p12 = pnand %p538_p11, %p535_p10 }
  0x3a   :  { %543 = shalt.err (!%p540_p12)
}
  0x3b   :  { %s544_s15 = scalar_lea.vmem %s45_s22, 16  ;;  %s548_s16 = scalar_lea.vmem %s45_s22, 32 }
  0x3c   :  { %p545_p13 = scmp.ne.s32.totalorder %s45_s22, %s544_s15  ;;  %p549_p0 = scmp.lt.s32.totalorder %s45_s22, %s45_s22 }
  0x3d   :  { %p550_p1 = scmp.lt.s32.totalorder %s548_s16, %s544_s15 }
  0x3f   :  { %p551_p2 = por %p550_p1, %p549_p0 }
  0x41   :  { %p552_p3 = pnand %p551_p2, %p545_p13 }
  0x43   :  { %555 = shalt.err (!%p552_p3)
}
  0x44   :  { %47 = dma.hbm_to_vmem [thread:$0]  %s740_s2, 16, %s45_s22, [#allocation6]  }
  0x45   :  { %s614_s6 = smov [#allocation10]   ;;  %s556_s19 = scalar_lea.hbm %s742_s4, 16 }
  0x46   :  { %s66_s1 = sshll.u32 %s614_s6, 4  ;;  %p557_p4 = scmp.ne.s32.totalorder %s742_s4, %s556_s19  ;;  %s67_s1 = int_to_ptr.vmem [resolvable:$true] %s66_s1 }
  0x47   :  { %p560_p5 = scmp.lt.u32.totalorder %s556_s19, %s742_s4 }
  0x49   :  { %p562_p6 = pnand %p560_p5, %p557_p4 }
  0x4b   :  { %565 = shalt.err (!%p562_p6)
}
  0x4c   :  { %s566_s26 = scalar_lea.vmem %s67_s1, 16  ;;  %s570_s2 = scalar_lea.vmem %s67_s1, 32 }
  0x4d   :  { %p567_p7 = scmp.ne.s32.totalorder %s67_s1, %s566_s26  ;;  %p571_p8 = scmp.lt.s32.totalorder %s67_s1, %s67_s1 }
  0x4e   :  { %p572_p9 = scmp.lt.s32.totalorder %s570_s2, %s566_s26 }
  0x50   :  { %p573_p10 = por %p572_p9, %p571_p8 }
  0x52   :  { %p574_p11 = pnand %p573_p10, %p567_p7 }
  0x54   :  { %577 = shalt.err (!%p574_p11)
}
  0x55   :  { %69 = dma.hbm_to_vmem [thread:$0]  %s742_s4, 16, %s67_s1, [#allocation9]  }
  0x56   :  { %600 = dma.done.wait [#allocation3], 128  }
  0x57   :  { %601 = vsyncadd [#allocation3], 4294967168 }
  0x58   :  { %602 = dma.done.wait [#allocation6], 1040  }
  0x59   :  { %603 = vsyncadd [#allocation6], 4294966256 }
  0x5a   :  { %604 = dma.done.wait [#allocation9], 1040  }
  0x5b   :  { %605 = vsyncadd [#allocation9], 4294966256  ;;  %v615_v0 = vmov 0.0   ;;  %vm616_vm0 = vmmov 0   ;;  %v447_v1 = vld [vmem:[#allocation5] sm:$0xff]   ;;  %v448_v2 = vld [vmem:[#allocation5 + $0x8] sm:$0xff]  }
  0x5c   :  { %395 = vmatprep.subr.bf16.mxu0 %v615_v0  ;;  %411 = vmatprep.mubr.msk.bf16.mxu0 %vm616_vm0, %v615_v0  ;;  %v449_v3 = vld [vmem:[#allocation5 + $0x10] sm:$0xff]   ;;  %v450_v4 = vld [vmem:[#allocation5 + $0x18] sm:$0xff]   ;;  %v451_v5 = vld [vmem:[#allocation5 + $0x20] sm:$0xff]   ;;  %s617_s4 = smov [#allocation11]  }
  0x5d   :  { %415 = vmatprep.subr.bf16.mxu1 %v615_v0  ;;  %431 = vmatprep.mubr.msk.bf16.mxu1 %vm616_vm0, %v615_v0  ;;  %v452_v6 = vld [vmem:[#allocation5 + $0x28] sm:$0xff]   ;;  %v453_v7 = vld [vmem:[#allocation5 + $0x30] sm:$0xff]   ;;  %v454_v8 = vld [vmem:[#allocation5 + $0x38] sm:$0xff]   ;;  %s344_s28 = sshll.u32 %s617_s4, 4  ;;  %s345_s28 = int_to_ptr.vmem [resolvable:$true] %s344_s28 }
  0x5e   :  { %396 = vmatpush3.bf16.msra.mxu0 %v447_v1  ;;  %v455_v9 = vld [vmem:[#allocation2] sm:$0xff]   ;;  %v456_v10 = vld [vmem:[#allocation8] sm:$0xff]   ;;  %v457_v11 = vld [vmem:[#allocation8 + $0x8] sm:$0xff]   ;;  %s578_s29 = scalar_lea.vmem %s345_s28, 256  ;;  %p583_p13 = scmp.lt.s32.totalorder %s345_s28, %s345_s28 }
  0x5f   :  { %397 = vmatprep.subr.bf16.mxu0 %v615_v0  ;;  %416 = vmatpush3.bf16.msra.mxu1 %v456_v10  ;;  %v458_v12 = vld [vmem:[#allocation8 + $0x10] sm:$0xff]   ;;  %v459_v13 = vld [vmem:[#allocation8 + $0x18] sm:$0xff]   ;;  %v460_v14 = vld [vmem:[#allocation8 + $0x20] sm:$0xff]   ;;  %p579_p12 = scmp.ne.s32.totalorder %s345_s28, %s578_s29  ;;  %p584_p0 = scmp.lt.s32.totalorder %s578_s29, %s578_s29 }
  0x60   :  { %417 = vmatprep.subr.bf16.mxu1 %v615_v0  ;;  %v461_v15 = vld [vmem:[#allocation8 + $0x28] sm:$0xff]   ;;  %v462_v16 = vld [vmem:[#allocation8 + $0x30] sm:$0xff]   ;;  %v463_v17 = vld [vmem:[#allocation8 + $0x38] sm:$0xff]  }
  0x61   :  { %v358_v18 = vld [vmem:[#allocation7] ss:$0 sm:$0xff]  ;;  %v368_v44 = vld [vmem:[#allocation10] ss:$0 sm:$0xff]  ;;  %p585_p1 = por %p584_p0, %p583_p13 }
  0x62   :  { %398 = vmatpush3.bf16.msra.mxu0 %v448_v2 }
  0x63   :  { %399 = vmatprep.subr.bf16.mxu0 %v615_v0  ;;  %418 = vmatpush3.bf16.msra.mxu1 %v457_v11  ;;  %p586_p2 = pnand %p585_p1, %p579_p12 }
  0x64   :  { %419 = vmatprep.subr.bf16.mxu1 %v615_v0 }
  0x66   :  { %400 = vmatpush3.bf16.msra.mxu0 %v449_v3 }
  0x67   :  { %401 = vmatprep.subr.bf16.mxu0 %v615_v0  ;;  %420 = vmatpush3.bf16.msra.mxu1 %v458_v12 }
  0x68   :  { %421 = vmatprep.subr.bf16.mxu1 %v615_v0 }
  0x6a   :  { %402 = vmatpush3.bf16.msra.mxu0 %v450_v4 }
  0x6b   :  { %403 = vmatprep.subr.bf16.mxu0 %v615_v0  ;;  %422 = vmatpush3.bf16.msra.mxu1 %v459_v13 }
  0x6c   :  { %423 = vmatprep.subr.bf16.mxu1 %v615_v0 }
  0x6e   :  { %404 = vmatpush3.bf16.msra.mxu0 %v451_v5 }
  0x6f   :  { %405 = vmatprep.subr.bf16.mxu0 %v615_v0  ;;  %424 = vmatpush3.bf16.msra.mxu1 %v460_v14 }
  0x70   :  { %425 = vmatprep.subr.bf16.mxu1 %v615_v0 }
  0x72   :  { %406 = vmatpush3.bf16.msra.mxu0 %v452_v6 }
  0x73   :  { %407 = vmatprep.subr.bf16.mxu0 %v615_v0  ;;  %426 = vmatpush3.bf16.msra.mxu1 %v461_v15 }
  0x74   :  { %427 = vmatprep.subr.bf16.mxu1 %v615_v0 }
  0x76   :  { %408 = vmatpush3.bf16.msra.mxu0 %v453_v7 }
  0x77   :  { %409 = vmatprep.subr.bf16.mxu0 %v615_v0  ;;  %428 = vmatpush3.bf16.msra.mxu1 %v462_v16 }
  0x78   :  { %429 = vmatprep.subr.bf16.mxu1 %v615_v0 }
  0x7a   :  { %410 = vmatpush3.bf16.msra.mxu0 %v454_v8 }
  0x7b   :  { %430 = vmatpush3.bf16.msra.mxu1 %v463_v17 }
  0x7d   :  { %412 = vmatmul.mubr.bf16.vlgmr.msra.gmra.mrb[0].mxu0 %v455_v9 }
 0x150   :  { %v199_v19 = vpop.f32.mrb[0].mxu0 }
 0x151   :  { %v200_v20 = vadd.f32 %v358_v18, %v199_v19  ;;  %v413_v21 = vpop.f32.mrb[1].mxu0 }
 0x152   :  { %v202_v22 = vpop.f32.mrb[2].mxu0 }
 0x153   :  { %v208_v23 = vmul.f32 0.044715, %v200_v20  ;;  %v203_v24 = vadd.f32 %v358_v18, %v202_v22  ;;  %v414_v25 = vpop.f32.mrb[3].mxu0  ;;  %v206_v38 = vmul.f32 0.5, %v200_v20 }
 0x155   :  { %v210_v26 = vmul.f32 %v208_v23, %v200_v20  ;;  %v209_v27 = vmul.f32 0.044715, %v203_v24  ;;  %v207_v39 = vmul.f32 0.5, %v203_v24 }
 0x157   :  { %v212_v28 = vmul.f32 %v210_v26, %v200_v20  ;;  %v211_v29 = vmul.f32 %v209_v27, %v203_v24 }
 0x159   :  { %v213_v30 = vmul.f32 %v211_v29, %v203_v24  ;;  %v214_v31 = vadd.f32 %v212_v28, %v200_v20 }
 0x15b   :  { %v215_v32 = vadd.f32 %v213_v30, %v203_v24  ;;  %v216_v33 = vmul.f32 0.7978846, %v214_v31 }
 0x15d   :  { %v217_v34 = vmul.f32 0.7978846, %v215_v32  ;;  %464 = vtanh.f32 %v216_v33 }
 0x15f   :  { %466 = vtanh.f32 %v217_v34 }
 0x167   :  { %v465_v35 = vpop.eup %464 }
 0x168   :  { %v220_v36 = vadd.f32 1.0, %v465_v35 }
 0x169   :  { %v467_v37 = vpop.eup %466 }
 0x16a   :  { %v221_v40 = vadd.f32 1.0, %v467_v37  ;;  %v222_v41 = vmul.f32 %v220_v36, %v206_v38 }
 0x16c   :  { %v223_v42 = vmul.f32 %v221_v40, %v207_v39 }
 0x16e   :  { %v224_v43 = vpack.c.bf16 %v223_v42, %v222_v41 }
 0x170   :  { %432 = vmatmul.mubr.bf16.vlgmr.msra.gmra.mrb[0].mxu1 %v224_v43 }
 0x243   :  { %v330_v45 = vpop.f32.mrb[0].mxu1 }
 0x244   :  { %v331_v46 = vadd.f32 %v368_v44, %v330_v45  ;;  %v433_v47 = vpop.f32.mrb[1].mxu1 }
 0x245   :  { %v333_v48 = vpop.f32.mrb[2].mxu1 }
 0x246   :  { %337 = vst [vmem:[#allocation11] sm:$0xff] %v331_v46  ;;  %v334_v49 = vadd.f32 %v368_v44, %v333_v48  ;;  %v434_v50 = vpop.f32.mrb[3].mxu1 }
 0x248   :  { %338 = vst [vmem:[#allocation11 + $0x8] sm:$0xff] %v334_v49 }
 0x249   :  { %589 = shalt.err (!%p586_p2)
}
 0x24a   :  { %s590_s7 = scalar_lea.hbm %s743_s5, 256 }
 0x24b   :  { %p591_p3 = scmp.ne.s32.totalorder %s743_s5, %s590_s7  ;;  %p594_p4 = scmp.lt.u32.totalorder %s590_s7, %s743_s5 }
 0x24d   :  { %p596_p5 = pnand %p594_p4, %p591_p3 }
 0x24f   :  { %599 = shalt.err (!%p596_p5)
}
 0x250   :  { %s618_s12 = smov 128   ;;  %s619_s13 = smov 8  }
 0x251   :  { %350 = dma.vmem_to_hbm [thread:$0]  %s345_s28, 256, %s743_s5, [#allocation4], %s618_s12, %s618_s12, %s619_s13  }
 0x252   :  { %606 = dma.done.wait [#allocation4], 256  }
 0x253   :  { %607 = vsyncadd [#allocation4], 4294967040 }
 0x254   :  { %354 = vsyncpa [#allocation3], 1 }
 0x255   :  { %355 = vsyncpa [#allocation6], 1 }
 0x256   :  { %356 = vsyncpa [#allocation9], 1 }
 0x257   :  { %357 = vsyncpa [#allocation4], 1 }

</bundles_post_ra>
